<compile_context>
chip_gen: v6e
topology: v6e:2x2x1
jax: 0.10.0
libtpu: 0.0.40
codegen_flags: <defaults>
</compile_context>

<pallas_src>
import functools

import jax
import jax.numpy as jnp
from jax.experimental import pallas as pl
from jax.experimental.pallas import tpu as pltpu


def _round_up(a: int, b: int) -> int:
    return (a + b - 1) // b * b


def _stddev_head_kernel(x_ref, w1_ref, b1_ref, w2_ref, b2_ref, out_ref, acc_ref,
                        *, scaling_factor: float, eps: float):
    # Grid: (row tiles [parallel], hidden chunks [arbitrary/reduction]).
    # x_ref:  (TN, D)      bf16 row tile (same block across hidden chunks)
    # w1_ref: (D, TH)      bf16 chunk of first Linear weight (in, out layout)
    # b1_ref: (1, TH)      f32 chunk of first bias
    # w2_ref: (TH, 4)      bf16 chunk of reordered/padded second weight
    # b2_ref: (1, 4)       f32 reordered second bias
    # out_ref:(TN, 4)      [c00, c01, c10, c11]
    # acc_ref:(TN, 4) f32  partial y accumulator across hidden chunks
    k = pl.program_id(1)
    nk = pl.num_programs(1)

    @pl.when(k == 0)
    def _init():
        acc_ref[...] = jnp.zeros_like(acc_ref)

    # Layer 1 (this hidden chunk) + ReLU.  bf16 x bf16 -> f32 accumulate.
    h = jnp.dot(x_ref[...], w1_ref[...], preferred_element_type=jnp.float32)
    h = jnp.maximum(h + b1_ref[...], 0.0)

    # Layer 2 partial product, accumulated over hidden chunks.
    acc_ref[...] += jnp.dot(h.astype(w2_ref.dtype), w2_ref[...],
                            preferred_element_type=jnp.float32)

    @pl.when(k == nk - 1)
    def _finalize():
        y = acc_ref[...] + b2_ref[...]
        # Column layout (set up by the wrapper): [y0, 0, y2, y1].
        # Diagonal columns (0, 3) get exp + clamp_min(eps); others pass through
        # (column 1 is exactly 0).  Single full-tile store, no lane concat.
        col = jax.lax.broadcasted_iota(jnp.int32, y.shape, 1)
        is_diag = jnp.logical_or(col == 0, col == 3)
        out = jnp.where(is_diag, jnp.maximum(jnp.exp(y), eps), y) * scaling_factor
        out_ref[...] = out.astype(out_ref.dtype)


def stddev_head(x, w1, b1, w2, b2, *, scaling_factor=1e-3, eps=1e-6,
                tile_n=256, tile_h=512, compute_dtype=jnp.bfloat16):
    """StdDevHead forward.  x: (..., d_model) -> Cholesky factor (..., 2, 2)."""
    *lead, d_model = x.shape
    x2 = x.reshape(-1, d_model)
    n = x2.shape[0]
    hidden = w1.shape[1]
    assert w1.shape == (d_model, hidden)
    assert w2.shape == (hidden, 3)

    # ---- row tiling: big tiles fill the MXU rows and amortize per-step
    # overhead; keep a multiple of 16 so bf16 tiles pack into (16, 128).
    n_min = _round_up(max(n, 1), 16)
    tile_n_eff = min(_round_up(tile_n, 16), n_min)
    n_total = _round_up(n, tile_n_eff)

    # ---- hidden-dim tiling: keeps resident weights / f32 intermediates small
    # at large d_model (v7x has only 64 MiB VMEM).
    if hidden <= max(tile_h, 128):
        tile_h_eff = hidden
        hidden_total = hidden
    else:
        tile_h_eff = _round_up(min(tile_h, hidden), 128)
        hidden_total = _round_up(hidden, tile_h_eff)

    # ---- pad rows (padded rows are sliced off afterwards).
    if n_total != n:
        x2 = jnp.pad(x2, ((0, n_total - n), (0, 0)))

    b1 = jnp.asarray(b1).reshape(1, hidden)
    b2 = jnp.asarray(b2).reshape(-1)

    # Reorder / zero-pad the second Linear so the kernel emits the row-major
    # 2x2 factor [c00, c01, c10, c11] directly:
    #   out col 0 <- y0 (diag0), col 1 <- 0, col 2 <- y2 (offdiag), col 3 <- y1 (diag1)
    zcol = jnp.zeros((hidden, 1), w2.dtype)
    w2_4 = jnp.concatenate([w2[:, 0:1], zcol, w2[:, 2:3], w2[:, 1:2]], axis=1)
    b2_4 = jnp.stack([b2[0], jnp.zeros((), b2.dtype), b2[2], b2[1]]).reshape(1, 4)

    # ---- pad hidden dim (zero weights + zero bias -> ReLU(0)=0 -> zero
    # contribution through zero-padded w2 rows; exact).
    if hidden_total != hidden:
        hp = hidden_total - hidden
        w1 = jnp.pad(w1, ((0, 0), (0, hp)))
        b1 = jnp.pad(b1, ((0, 0), (0, hp)))
        w2_4 = jnp.pad(w2_4, ((0, hp), (0, 0)))

    # ---- bf16 operands for the MXU (f32 accumulation); biases stay f32.
    x2 = x2.astype(compute_dtype)
    w1c = w1.astype(compute_dtype)
    w2c = w2_4.astype(compute_dtype)
    b1c = b1.astype(jnp.float32)
    b2c = b2_4.astype(jnp.float32)

    grid = (n_total // tile_n_eff, hidden_total // tile_h_eff)

    kernel = functools.partial(
        _stddev_head_kernel, scaling_factor=float(scaling_factor), eps=float(eps))

    itemsize = jnp.dtype(compute_dtype).itemsize
    cost = pl.CostEstimate(
        flops=2 * n_total * hidden_total * (d_model + 4),
        transcendentals=4 * n_total,
        bytes_accessed=(x2.size + w1c.size + w2c.size) * itemsize + n_total * 4 * 4,
    )

    out_flat = pl.pallas_call(
        kernel,
        out_shape=jax.ShapeDtypeStruct((n_total, 4), jnp.float32),
        grid_spec=pltpu.PrefetchScalarGridSpec(
            num_scalar_prefetch=0,
            grid=grid,
            in_specs=[
                pl.BlockSpec((tile_n_eff, d_model), lambda i, k: (i, 0)),  # x rows
                pl.BlockSpec((d_model, tile_h_eff), lambda i, k: (0, k)),  # w1 chunk
                pl.BlockSpec((1, tile_h_eff), lambda i, k: (0, k)),        # b1 chunk
                pl.BlockSpec((tile_h_eff, 4), lambda i, k: (k, 0)),        # w2 chunk
                pl.BlockSpec((1, 4), lambda i, k: (0, 0)),                 # b2
            ],
            out_specs=pl.BlockSpec((tile_n_eff, 4), lambda i, k: (i, 0)),
            scratch_shapes=[pltpu.VMEM((tile_n_eff, 4), jnp.float32)],
        ),
        compiler_params=pltpu.CompilerParams(
            dimension_semantics=("parallel", "arbitrary"),
            vmem_limit_bytes=48 * 1024 * 1024,
        ),
        cost_estimate=cost,
    )(x2, w1c, b1c, w2c, b2c)

    return out_flat[:n].reshape(*lead, 2, 2)


def _reference(x, w1, b1, w2, b2, scaling_factor=1e-3, eps=1e-6):
    x = x.astype(jnp.float32)
    h = jnp.maximum(x @ w1 + jnp.asarray(b1).reshape(-1), 0.0)
    y = h @ w2 + jnp.asarray(b2).reshape(-1)
    diag = jnp.maximum(jnp.exp(y[..., :2]), eps)
    off = y[..., 2]
    chol = jnp.zeros(y.shape[:-1] + (2, 2), jnp.float32)
    chol = chol.at[..., 0, 0].set(diag[..., 0])
    chol = chol.at[..., 1, 1].set(diag[..., 1])
    chol = chol.at[..., 1, 0].set(off)
    return chol * scaling_factor


if __name__ == "__main__":
    key = jax.random.PRNGKey(0)

    def make_params(k, d_model):
        k1, k2, k3, k4 = jax.random.split(k, 4)
        bound = 1.0 / float(d_model) ** 0.5  # torch.nn.Linear default init range
        w1 = jax.random.uniform(k1, (d_model, d_model), jnp.float32, -bound, bound)
        b1 = jax.random.uniform(k2, (d_model,), jnp.float32, -bound, bound)
        w2 = jax.random.uniform(k3, (d_model, 3), jnp.float32, -bound, bound)
        b2 = jax.random.uniform(k4, (3,), jnp.float32, -bound, bound)
        return w1, b1, w2, b2

    # Case 1: small transformer-like shapes (single row tile, single hidden chunk).
    d_model, batch, seq = 32, 2, 8
    kp, kx, key = jax.random.split(key, 3)
    w1, b1, w2, b2 = make_params(kp, d_model)
    x = jax.random.normal(kx, (batch, seq, d_model), jnp.float32)
    out = jax.block_until_ready(stddev_head(x, w1, b1, w2, b2))
    ref = _reference(x, w1, b1, w2, b2)
    assert out.shape == (batch, seq, 2, 2), out.shape
    assert jnp.allclose(out, ref, atol=1e-4, rtol=5e-2), (
        "case1 max abs err %e" % float(jnp.max(jnp.abs(out - ref))))

    # Case 2: exercises row tiling + hidden-dim accumulation (grid = (3, 2)).
    d_model2, n2 = 256, 48
    kp2, kx2, key = jax.random.split(key, 3)
    w1b, b1b, w2b, b2b = make_params(kp2, d_model2)
    xb = jax.random.normal(kx2, (n2, d_model2), jnp.float32)
    out2 = jax.block_until_ready(
        stddev_head(xb, w1b, b1b, w2b, b2b, tile_n=16, tile_h=128))
    ref2 = _reference(xb, w1b, b1b, w2b, b2b)
    assert out2.shape == (n2, 2, 2), out2.shape
    assert jnp.allclose(out2, ref2, atol=1e-4, rtol=5e-2), (
        "case2 max abs err %e" % float(jnp.max(jnp.abs(out2 - ref2))))

    print("KERNEL_OK")
</pallas_src>

<mosaic_0001>
module attributes {stable_mosaic.version = 11 : i64} {
  func.func @_stddev_head_kernel(%arg0: i32, %arg1: i32, %arg2: memref<16x32xbf16, #tpu.memory_space<vmem>>, %arg3: memref<32x32xbf16, #tpu.memory_space<vmem>>, %arg4: memref<1x32xf32, #tpu.memory_space<vmem>>, %arg5: memref<32x4xbf16, #tpu.memory_space<vmem>>, %arg6: memref<1x4xf32, #tpu.memory_space<vmem>>, %arg7: memref<16x4xf32, #tpu.memory_space<vmem>>, %arg8: memref<16x4xf32, #tpu.memory_space<vmem>>) attributes {dimension_semantics = [#tpu.dimension_semantics<parallel>, #tpu.dimension_semantics<arbitrary>], iteration_bounds = array<i64: 1, 1>, scalar_prefetch = 0 : i64, scratch_operands = 1 : i64, tpu.core_type = #tpu.core_type<tc>, window_params = [{transform_indices = @transform_0, window_bounds = array<i64: 16, 32>}, {transform_indices = @transform_1, window_bounds = array<i64: 32, 32>}, {transform_indices = @transform_2, window_bounds = array<i64: 1, 32>}, {transform_indices = @transform_3, window_bounds = array<i64: 32, 4>}, {pipeline_mode = #tpu.pipeline_mode<synchronous>, transform_indices = @transform_4, window_bounds = array<i64: 1, 4>}, {transform_indices = @transform_5, window_bounds = array<i64: 16, 4>}]} {
    %c0_i32 = arith.constant 0 : i32
    %0 = arith.cmpi eq, %arg1, %c0_i32 : i32
    %1 = arith.extui %0 : i1 to i32
    %c0_i32_0 = arith.constant 0 : i32
    %2 = arith.cmpi ne, %1, %c0_i32_0 : i32
    scf.if %2 {
      %cst_16 = arith.constant 0.000000e+00 : f32
      %20 = vector.broadcast %cst_16 : f32 to vector<16x4xf32>
      %c0_17 = arith.constant 0 : index
      %c0_18 = arith.constant 0 : index
      %21 = vector.load %arg8[%c0_17, %c0_18] : memref<16x4xf32, #tpu.memory_space<vmem>>, vector<16x4xf32>
      tpu.vector_store %arg8[%c0_17, %c0_18], %20 {strides = array<i32>} : memref<16x4xf32, #tpu.memory_space<vmem>>, vector<16x4xf32>,
    } else {
    }
    %c0 = arith.constant 0 : index
    %c0_1 = arith.constant 0 : index
    %3 = vector.load %arg2[%c0, %c0_1] : memref<16x32xbf16, #tpu.memory_space<vmem>>, vector<16x32xbf16>
    %c0_2 = arith.constant 0 : index
    %c0_3 = arith.constant 0 : index
    %4 = vector.load %arg3[%c0_2, %c0_3] : memref<32x32xbf16, #tpu.memory_space<vmem>>, vector<32x32xbf16>
    %cst = arith.constant dense<0.000000e+00> : vector<16x32xf32>
    %5 = tpu.matmul %3, %4, %cst {dimension_numbers = #tpu.dot_dimension_numbers<[1], [0], [0], [1], [0, 0, 1, 1], [], []>} : vector<16x32xbf16>, vector<32x32xbf16>, vector<16x32xf32> -> vector<16x32xf32>
    %c0_4 = arith.constant 0 : index
    %c0_5 = arith.constant 0 : index
    %6 = vector.load %arg4[%c0_4, %c0_5] : memref<1x32xf32, #tpu.memory_space<vmem>>, vector<1x32xf32>
    %7 = vector.broadcast %6 : vector<1x32xf32> to vector<16x32xf32>
    %8 = arith.addf %5, %7 : vector<16x32xf32>
    %cst_6 = arith.constant 0.000000e+00 : f32
    %9 = vector.broadcast %cst_6 : f32 to vector<16x32xf32>
    %10 = arith.maximumf %8, %9 : vector<16x32xf32>
    %c0_7 = arith.constant 0 : index
    %c0_8 = arith.constant 0 : index
    %11 = vector.load %arg8[%c0_7, %c0_8] : memref<16x4xf32, #tpu.memory_space<vmem>>, vector<16x4xf32>
    %12 = arith.truncf %10 : vector<16x32xf32> to vector<16x32xbf16>
    %c0_9 = arith.constant 0 : index
    %c0_10 = arith.constant 0 : index
    %13 = vector.load %arg5[%c0_9, %c0_10] : memref<32x4xbf16, #tpu.memory_space<vmem>>, vector<32x4xbf16>
    %cst_11 = arith.constant dense<0.000000e+00> : vector<16x4xf32>
    %14 = tpu.matmul %12, %13, %cst_11 {dimension_numbers = #tpu.dot_dimension_numbers<[1], [0], [0], [1], [0, 0, 1, 1], [], []>} : vector<16x32xbf16>, vector<32x4xbf16>, vector<16x4xf32> -> vector<16x4xf32>
    %15 = arith.addf %11, %14 : vector<16x4xf32>
    %c0_12 = arith.constant 0 : index
    %c0_13 = arith.constant 0 : index
    %16 = vector.load %arg8[%c0_12, %c0_13] : memref<16x4xf32, #tpu.memory_space<vmem>>, vector<16x4xf32>
    tpu.vector_store %arg8[%c0_12, %c0_13], %15 {strides = array<i32>} : memref<16x4xf32, #tpu.memory_space<vmem>>, vector<16x4xf32>,
    %c0_i32_14 = arith.constant 0 : i32
    %17 = arith.cmpi eq, %arg1, %c0_i32_14 : i32
    %18 = arith.extui %17 : i1 to i32
    %c0_i32_15 = arith.constant 0 : i32
    %19 = arith.cmpi ne, %18, %c0_i32_15 : i32
    scf.if %19 {
      %c0_16 = arith.constant 0 : index
      %c0_17 = arith.constant 0 : index
      %20 = vector.load %arg8[%c0_16, %c0_17] : memref<16x4xf32, #tpu.memory_space<vmem>>, vector<16x4xf32>
      %c0_18 = arith.constant 0 : index
      %c0_19 = arith.constant 0 : index
      %21 = vector.load %arg6[%c0_18, %c0_19] : memref<1x4xf32, #tpu.memory_space<vmem>>, vector<1x4xf32>
      %22 = vector.broadcast %21 : vector<1x4xf32> to vector<16x4xf32>
      %23 = arith.addf %20, %22 : vector<16x4xf32>
      %24 = tpu.iota {dimensions = array<i32: 1>} : vector<16x4xi32>
      %c0_i32_20 = arith.constant 0 : i32
      %25 = vector.broadcast %c0_i32_20 : i32 to vector<16x4xi32>
      %26 = arith.cmpi eq, %24, %25 : vector<16x4xi32>
      %c3_i32 = arith.constant 3 : i32
      %27 = vector.broadcast %c3_i32 : i32 to vector<16x4xi32>
      %28 = arith.cmpi eq, %24, %27 : vector<16x4xi32>
      %29 = arith.ori %26, %28 : vector<16x4xi1>
      %30 = math.exp %23 : vector<16x4xf32>
      %cst_21 = arith.constant 9.99999997E-7 : f32
      %31 = vector.broadcast %cst_21 : f32 to vector<16x4xf32>
      %32 = arith.maximumf %30, %31 : vector<16x4xf32>
      %33 = arith.select %29, %32, %23 : vector<16x4xi1>, vector<16x4xf32>
      %cst_22 = arith.constant 1.000000e-03 : f32
      %34 = vector.broadcast %cst_22 : f32 to vector<16x4xf32>
      %35 = arith.mulf %33, %34 : vector<16x4xf32>
      %c0_23 = arith.constant 0 : index
      %c0_24 = arith.constant 0 : index
      %36 = vector.load %arg7[%c0_23, %c0_24] : memref<16x4xf32, #tpu.memory_space<vmem>>, vector<16x4xf32>
      tpu.vector_store %arg7[%c0_23, %c0_24], %35 {strides = array<i32>} : memref<16x4xf32, #tpu.memory_space<vmem>>, vector<16x4xf32>,
    } else {
    }
    return
  }
  func.func @transform_0(%arg0: i32, %arg1: i32) -> (i32, i32) {
    %c0_i32 = arith.constant 0 : i32
    %c0_i32_0 = arith.constant 0 : i32
    return %arg0, %c0_i32 : i32, i32
  }
  func.func @transform_1(%arg0: i32, %arg1: i32) -> (i32, i32) {
    %c0_i32 = arith.constant 0 : i32
    %c0_i32_0 = arith.constant 0 : i32
    return %c0_i32, %arg1 : i32, i32
  }
  func.func @transform_2(%arg0: i32, %arg1: i32) -> (i32, i32) {
    %c0_i32 = arith.constant 0 : i32
    %c0_i32_0 = arith.constant 0 : i32
    return %c0_i32, %arg1 : i32, i32
  }
  func.func @transform_3(%arg0: i32, %arg1: i32) -> (i32, i32) {
    %c0_i32 = arith.constant 0 : i32
    %c0_i32_0 = arith.constant 0 : i32
    return %arg1, %c0_i32 : i32, i32
  }
  func.func @transform_4(%arg0: i32, %arg1: i32) -> (i32, i32) {
    %c0_i32 = arith.constant 0 : i32
    %c0_i32_0 = arith.constant 0 : i32
    %c0_i32_1 = arith.constant 0 : i32
    return %c0_i32, %c0_i32_0 : i32, i32
  }
  func.func @transform_5(%arg0: i32, %arg1: i32) -> (i32, i32) {
    %c0_i32 = arith.constant 0 : i32
    %c0_i32_0 = arith.constant 0 : i32
    return %arg0, %c0_i32 : i32, i32
  }
}

</mosaic_0001>

<bundles_post_ra>
// kernel: tpu_custom_call.1
= control target key start
LH: loop header
LB: loop body
LE: loop exit
PB: predicated region body
PF: predicated region fallthrough
CT: control target
= control target key end

     0   :  { %10 = vsyncpa [#allocation4], 0  ;;  %s290_s18 = smov [#allocation3]   ;;  %s360_s0 = inlined_call_operand.hbm [shape: bf16[16,32], index: 0, kind: input, shape index: {}]   ;;  %s361_s1 = inlined_call_operand.vmem [shape: bf16[32,32], index: 1, kind: input, shape index: {}]   ;;  %s362_s2 = inlined_call_operand.vmem [shape: f32[1,32], index: 2, kind: input, shape index: {}]   ;;  %s363_s3 = inlined_call_operand.vmem [shape: bf16[32,4], index: 3, kind: input, shape index: {}]   ;;  %s364_s4 = inlined_call_operand.vmem [shape: f32[1,4], index: 4, kind: input, shape index: {}]   ;;  %s365_s5 = inlined_call_operand.vmem [shape: f32[16,4], index: 5, kind: output, shape index: {}]  }
   0x1   :  { %s16_s19 = sshll.u32 %s290_s18, 4  ;;  %s17_s19 = int_to_ptr.vmem [resolvable:$true] %s16_s19 }
   0x2   :  { %s276_s20 = scalar_lea.vmem %s17_s19, 128  ;;  %p281_p1 = scmp.lt.s32.totalorder %s17_s19, %s17_s19 }
   0x3   :  { %p277_p0 = scmp.ne.s32.totalorder %s17_s19, %s276_s20  ;;  %p282_p2 = scmp.lt.s32.totalorder %s276_s20, %s276_s20 }
   0x5   :  { %p283_p3 = por %p282_p2, %p281_p1 }
   0x7   :  { %p284_p4 = pnand %p283_p3, %p277_p0 }
   0x9   :  { %287 = shalt.err (!%p284_p4)
}
   0xa   :  { %s291_s21 = smov 64   ;;  %s292_s22 = smov 4  }
   0xb   :  { %22 = dma.hbm_to_vmem [thread:$0]  %s360_s0, 128, %s17_s19, [#allocation4], %s291_s21, %s291_s21, %s292_s22  }
   0xc   :  { %288 = dma.done.wait [#allocation4], 128  }
   0xd   :  { %289 = vsyncadd [#allocation4], 4294967168  ;;  %v293_v0 = vmov 0.0   ;;  %vm294_vm0 = vmmov 0   ;;  %v259_v1 = vld [vmem:[%s361_s1 + $0x8] sm:$0xff]   ;;  %v260_v2 = vld [vmem:[%s361_s1] sm:$0xff]   ;;  %v201_v30 = vlaneseq }
   0xe   :  { %238 = vmatprep.subr.bf16.mxu0 %v293_v0  ;;  %242 = vmatprep.mubr.msk.bf16.mxu0 %vm294_vm0, %v293_v0  ;;  %v261_v3 = vld [vmem:[#allocation3] sm:$0xff]   ;;  %vm72_vm1 = vcmask 261120   ;;  %v262_v4 = vld [vmem:[%s363_s3 + $0x8] sm:$0xff]   ;;  %v263_v5 = vld [vmem:[%s363_s3] sm:$0xff]   ;;  %vm39_vm2 = vcmask 31744  }
   0xf   :  { %246 = vmatprep.subr.bf16.mxu1 %v293_v0  ;;  %250 = vmatprep.mubr.msk.bf16.mxu1 %vm294_vm0, %v293_v0  ;;  %40 = vst.msk [vmem:[#allocation2] sm:$0xff] %vm39_vm2, %v293_v0  ;;  %41 = vst.msk [vmem:[#allocation2 + $0x8] sm:$0xff] %vm39_vm2, %v293_v0  ;;  %v223_v6 = vld [vmem:[%s362_s2] ss:$0 sm:$0xff]  ;;  %v202_v32 = vand.u32 127, %v201_v30 }
  0x10   :  { %239 = vmatpush3.bf16.msra.mxu0 %v259_v1  ;;  %247 = vmatpush3.bf16.msra.mxu1 %v262_v4  ;;  %v231_v24 = vld [vmem:[%s364_s4] ss:$0 sm:$0xff] }
  0x11   :  { %240 = vmatprep.subr.bf16.mxu0 %v293_v0  ;;  %248 = vmatprep.subr.bf16.mxu1 %v293_v0  ;;  %vm203_vm3 = vcmp.eq.s32.totalorder %v202_v32, 0  ;;  %vm204_vm4 = vcmp.eq.s32.totalorder %v202_v32, 3 }
  0x12   :  { %vm205_vm5 = vmor %vm203_vm3, %vm204_vm4 }
  0x14   :  { %241 = vmatpush3.bf16.msra.mxu0 %v260_v2  ;;  %249 = vmatpush3.bf16.msra.mxu1 %v263_v5 }
  0x16   :  { %v119_v16 = vld [vmem:[#allocation2] sm:$0xff]  ;;  %v120_v20 = vld [vmem:[#allocation2 + $0x8] sm:$0xff] }
  0x17   :  { %243 = vmatmul.mubr.msk.bf16.vlgmr.msra.gmra.mxu0 %vm72_vm1, %v261_v3 }
  0xd7   :  { %v110_v7 = vpop.f32.mrf.mxu0 }
  0xd8   :  { %v111_v9 = vadd.f32 %v223_v6, %v110_v7 }
  0xd9   :  { %v244_v8 = vpop.f32.mrf.mxu0 }
  0xda   :  { %v117_v13 = vmax.f32 %v111_v9, 0.0 }
  0xdb   :  { %v113_v10 = vpop.f32.mrf.mxu0 }
  0xdc   :  { %v114_v11 = vadd.f32 %v223_v6, %v113_v10 }
  0xdd   :  { %v245_v12 = vpop.f32.mrf.mxu0 }
  0xde   :  { %v118_v14 = vmax.f32 %v114_v11, 0.0 }
  0xe0   :  { %v121_v15 = vpack.c.bf16 %v118_v14, %v117_v13 }
  0xe2   :  { %251 = vmatmul.mubr.msk.bf16.vlgmr.msra.gmra.mxu1 %vm72_vm1, %v121_v15 }
 0x1a2   :  { %v175_v17 = vpop.f32.mrf.mxu1 }
 0x1a3   :  { %v182_v18 = vadd.f32 %v175_v17, %v119_v16 }
 0x1a4   :  { %v252_v19 = vpop.f32.mrf.mxu1 }
 0x1a5   :  { %185 = vst.msk [vmem:[#allocation2] sm:$0xff] %vm39_vm2, %v182_v18 }
 0x1a6   :  { %v178_v21 = vpop.f32.mrf.mxu1 }
 0x1a7   :  { %v183_v22 = vadd.f32 %v178_v21, %v120_v20 }
 0x1a8   :  { %v253_v23 = vpop.f32.mrf.mxu1 }
 0x1a9   :  { %186 = vst.msk [vmem:[#allocation2 + $0x8] sm:$0xff] %vm39_vm2, %v183_v22 }
 0x1ac   :  { %v190_v25 = vld [vmem:[#allocation2] sm:$0xff] }
 0x1ad   :  { %v199_v26 = vadd.f32 %v231_v24, %v190_v25 }
 0x1af   :  { %v206_v27 = vmul.f32 1.442695, %v199_v26 }
 0x1b0   :  { %v191_v28 = vld [vmem:[#allocation2 + $0x8] sm:$0xff] }
 0x1b1   :  { %264 = vpow2.f32 %v206_v27  ;;  %v200_v29 = vadd.f32 %v231_v24, %v191_v28 }
 0x1b3   :  { %v208_v31 = vmul.f32 1.442695, %v200_v29 }
 0x1b5   :  { %266 = vpow2.f32 %v208_v31 }
 0x1be   :  { %v265_v33 = vpop.eup %264 }
 0x1bf   :  { %v210_v34 = vmax.f32 %v265_v33, 1e-06 }
 0x1c1   :  { %v212_v35 = vsel %vm205_vm5, %v210_v34, %v199_v26 }
 0x1c2   :  { %v267_v36 = vpop.eup %266  ;;  %v214_v37 = vmul.f32 0.001, %v212_v35 }
 0x1c3   :  { %v211_v38 = vmax.f32 %v267_v36, 1e-06 }
 0x1c4   :  { %216 = vst.msk [vmem:[%s365_s5] sm:$0xff] %vm39_vm2, %v214_v37 }
 0x1c5   :  { %v213_v39 = vsel %vm205_vm5, %v211_v38, %v200_v29 }
 0x1c6   :  { %v215_v40 = vmul.f32 0.001, %v213_v39 }
 0x1c8   :  { %217 = vst.msk [vmem:[%s365_s5 + $0x8] sm:$0xff] %vm39_vm2, %v215_v40 }
 0x1c9   :  { %222 = vsyncpa [#allocation4], 1 }

</bundles_post_ra>
